<compile_context>
chip_gen: v5e
topology: v5e:2x2
jax: 0.10.0
libtpu: 0.0.40
codegen_flags: <defaults>
</compile_context>

<pallas_src>
import functools

import jax
import jax.numpy as jnp
from jax import lax
from jax.experimental import pallas as pl
from jax.experimental.pallas import tpu as pltpu

_EPS = 1e-8


def _round_up(x, m):
    return ((x + m - 1) // m) * m


def _hw_params():
    """Best-effort (VMEM capacity, TensorCore count) with safe fallbacks."""
    vmem_bytes = None
    num_cores = None
    try:
        info = pltpu.get_tpu_info()
        vmem_bytes = getattr(info, "vmem_capacity_bytes", None)
        for attr in ("num_cores", "num_tensorcores", "tensorcore_count",
                     "cores_per_chip"):
            v = getattr(info, attr, None)
            if isinstance(v, int) and v > 0:
                num_cores = v
                break
        if num_cores is None and vmem_bytes:
            # Heuristic: 64-MiB-VMEM parts (v7x) have 2 TCs; 128-MiB parts 1.
            num_cores = 2 if vmem_bytes < 100 * 1024 * 1024 else 1
    except Exception:
        pass
    if not vmem_bytes or vmem_bytes <= 0:
        vmem_bytes = 64 * 1024 * 1024      # conservative (v7x-sized)
    if not num_cores or num_cores <= 0:
        num_cores = 1                      # conservative: never add a fake split
    return vmem_bytes, num_cores


def _cosine_distance_kernel(p_ref, t_ref, o_ref, *,
                            total_rows, tm, rm, n_chunks,
                            tiles_per_core, last_tile):
    c = pl.program_id(0)          # core-split axis ("parallel")
    i = pl.program_id(1)          # row-tile axis ("arbitrary", reduction)

    @pl.when(i == 0)
    def _():
        o_ref[...] = jnp.zeros_like(o_ref)

    tile = c * tiles_per_core + i   # unclamped logical tile index
    row0 = tile * tm
    inv_eps = 1.0 / _EPS

    def chunk_dist(ci):
        # Bounded row chunk: keeps f32 upcasts / products / (rm, 1) per-row
        # reductions to a few hundred KiB of VMEM temporaries per iteration.
        r = pl.multiple_of(ci * rm, rm)
        p = p_ref[pl.ds(r, rm), :].astype(jnp.float32)
        t = t_ref[pl.ds(r, rm), :].astype(jnp.float32)
        w12 = jnp.sum(p * t, axis=-1, keepdims=True)   # (rm, 1) dot products
        w1 = jnp.sum(p * p, axis=-1, keepdims=True)    # (rm, 1) ||p||^2
        w2 = jnp.sum(t * t, axis=-1, keepdims=True)    # (rm, 1) ||t||^2
        # 1 / max(||x||, eps) == min(rsqrt(||x||^2), 1/eps); rsqrt is on the EUP.
        inv_n1 = jnp.minimum(lax.rsqrt(w1), inv_eps)
        inv_n2 = jnp.minimum(lax.rsqrt(w2), inv_eps)
        return 1.0 - w12 * inv_n1 * inv_n2, r

    # Interior tiles: every row is valid, no mask work at all.
    @pl.when(tile < last_tile)
    def _():
        def body(ci, acc):
            dist, _ = chunk_dist(ci)
            return acc + jnp.sum(dist, keepdims=True)
        tot = lax.fori_loop(0, n_chunks, body, jnp.zeros((1, 1), jnp.float32))
        o_ref[...] += tot

    # Last (and any clamped duplicate) tile: mask rows past total_rows.  Keep
    # the select form — padded rows may hold garbage producing inf/NaN.
    @pl.when(tile >= last_tile)
    def _():
        def body(ci, acc):
            dist, r = chunk_dist(ci)
            ridx = row0 + r + lax.broadcasted_iota(jnp.int32, (rm, 1), 0)
            dist = jnp.where(ridx < total_rows, dist, 0.0)
            return acc + jnp.sum(dist, keepdims=True)
        tot = lax.fori_loop(0, n_chunks, body, jnp.zeros((1, 1), jnp.float32))
        o_ref[...] += tot

    @pl.when(i == pl.num_programs(1) - 1)
    def _():
        o_ref[...] = o_ref[...] * (1.0 / total_rows)


def cosine_distance(pred, target, *, max_rows_per_tile=None):
    """Mean cosine distance, equivalent to
    torch.mean(1 - F.cosine_similarity(pred, target, eps=1e-8, dim=-1))."""
    assert pred.shape == target.shape
    d = pred.shape[-1]
    p2 = pred.reshape(-1, d)
    t2 = target.reshape(-1, d)
    m = p2.shape[0]

    vmem_bytes, num_cores = _hw_params()
    big_vmem = vmem_bytes >= 100 * 1024 * 1024
    if big_vmem:
        # 128-MiB-VMEM parts (v5e/v6e): roomy buffers, bigger scoped limit.
        input_budget = 44 * 1024 * 1024
        vmem_limit = 64 * 1024 * 1024
    else:
        # 64-MiB-VMEM parts (v7x) or unknown: stay inside the 32 MiB scoped
        # limit with 4 pipeline buffers + temporaries + Mosaic internal scratch.
        input_budget = 22 * 1024 * 1024
        vmem_limit = 32 * 1024 * 1024
    target_step_bytes = 8 * 1024 * 1024   # combined pred+target HBM traffic/step

    itemsize = jnp.dtype(p2.dtype).itemsize
    # Sublane packing granularity: 8 for 4-byte, 16 for 2-byte, 32 for 1-byte.
    row_mult = max(8, 32 // itemsize)
    d_pad = _round_up(d, 128)             # lanes actually occupied in VMEM

    # Row tile sizing:
    #   * budget_tm: 2 inputs x 2 pipeline buffers x tm x d_pad x itemsize
    #     must fit in the input VMEM budget.
    #   * target_tm: aim for ~target_step_bytes of real HBM traffic per grid
    #     step so the ~0.35us/step pipeline overhead stays in the noise.
    bytes_per_row_vmem = 4 * d_pad * itemsize
    bytes_per_row_hbm = 2 * d * itemsize
    budget_tm = max(row_mult,
                    (input_budget // bytes_per_row_vmem) // row_mult * row_mult)
    target_tm = _round_up(max(1, pl.cdiv(target_step_bytes, bytes_per_row_hbm)),
                          row_mult)
    tm = min(budget_tm, target_tm)
    if max_rows_per_tile is not None:
        tm = min(tm, max(row_mult, (max_rows_per_tile // row_mult) * row_mult))
    tm = max(row_mult, min(tm, _round_up(m, row_mult)))

    # In-kernel compute chunk: bound f32 intermediates to ~512 KiB each.
    chunk_elems = 128 * 1024
    rm = max(row_mult, (chunk_elems // d_pad) // row_mult * row_mult)
    rm = min(rm, tm)
    tm = (tm // rm) * rm                  # tile is a whole number of chunks
    n_chunks = tm // rm

    tiles_total = pl.cdiv(m, tm)
    # Split row tiles across TensorCores only on real multi-TC chips (v7x);
    # on 1-TC v5e/v6e a split axis would just be a serial loop with redundant
    # masked steps.
    n_split = num_cores if (num_cores > 1 and tiles_total >= num_cores) else 1
    tiles_per_core = pl.cdiv(tiles_total, n_split)
    last_tile = tiles_total - 1

    def in_index_map(c, i):
        tile = c * tiles_per_core + i
        # Clamp logical tiles past the end of the data (only possible on the
        # multi-core split path); their rows are fully masked in-kernel.
        return (jnp.minimum(tile, last_tile), 0)

    kernel = functools.partial(
        _cosine_distance_kernel,
        total_rows=m, tm=tm, rm=rm, n_chunks=n_chunks,
        tiles_per_core=tiles_per_core, last_tile=last_tile)

    partials = pl.pallas_call(
        kernel,
        out_shape=jax.ShapeDtypeStruct((n_split, 1), jnp.float32),
        grid_spec=pltpu.PrefetchScalarGridSpec(
            num_scalar_prefetch=0,
            grid=(n_split, tiles_per_core),
            in_specs=[
                pl.BlockSpec((tm, d), in_index_map),
                pl.BlockSpec((tm, d), in_index_map),
            ],
            out_specs=pl.BlockSpec((1, 1), lambda c, i: (c, 0)),
        ),
        compiler_params=pltpu.CompilerParams(
            dimension_semantics=("parallel", "arbitrary"),
            vmem_limit_bytes=vmem_limit,
        ),
    )(p2, t2)
    # Sum per-core partial means (each already scaled by 1/M).
    return jnp.sum(partials)


def _ref(p, t):
    """Pure-JAX reference matching current PyTorch cosine_similarity."""
    p = p.astype(jnp.float32)
    t = t.astype(jnp.float32)
    w12 = jnp.sum(p * t, axis=-1)
    n1 = jnp.maximum(jnp.sqrt(jnp.sum(p * p, axis=-1)), _EPS)
    n2 = jnp.maximum(jnp.sqrt(jnp.sum(t * t, axis=-1)), _EPS)
    cos = w12 / (n1 * n2)
    return jnp.mean(1.0 - cos)


if __name__ == "__main__":
    key = jax.random.PRNGKey(0)
    kp, kt, kp2, kt2 = jax.random.split(key, 4)

    # pred/target: (batch=2, seq=8, hidden=32); cosine similarity along dim=-1.
    pred = jax.random.normal(kp, (2, 8, 32), dtype=jnp.float32)
    target = jax.random.normal(kt, (2, 8, 32), dtype=jnp.float32)

    loss = jax.block_until_ready(cosine_distance(pred, target))
    expected = _ref(pred, target)
    assert jnp.allclose(loss, expected, atol=1e-5, rtol=1e-4), (loss, expected)

    # Second case: M not divisible by the tile -> exercises the tail mask,
    # the interior/tail pl.when split, and the multi-tile reduction grid.
    pred2 = jax.random.normal(kp2, (4, 9, 32), dtype=jnp.float32)
    target2 = jax.random.normal(kt2, (4, 9, 32), dtype=jnp.float32)

    loss2 = jax.block_until_ready(
        cosine_distance(pred2, target2, max_rows_per_tile=16))
    expected2 = _ref(pred2, target2)
    assert jnp.allclose(loss2, expected2, atol=1e-5, rtol=1e-4), (loss2, expected2)

    print("KERNEL_OK")
</pallas_src>

<mosaic_0001>
module attributes {stable_mosaic.version = 11 : i64} {
  func.func @_cosine_distance_kernel(%arg0: i32, %arg1: i32, %arg2: memref<16x32xf32, #tpu.memory_space<vmem>>, %arg3: memref<16x32xf32, #tpu.memory_space<vmem>>, %arg4: memref<1x1xf32, #tpu.memory_space<vmem>>) attributes {dimension_semantics = [#tpu.dimension_semantics<parallel>, #tpu.dimension_semantics<arbitrary>], iteration_bounds = array<i64: 1, 1>, scalar_prefetch = 0 : i64, scratch_operands = 0 : i64, tpu.core_type = #tpu.core_type<tc>, window_params = [{transform_indices = @transform_0, window_bounds = array<i64: 16, 32>}, {transform_indices = @transform_1, window_bounds = array<i64: 16, 32>}, {transform_indices = @transform_2, window_bounds = array<i64: 1, 1>}]} {
    %c0_i32 = arith.constant 0 : i32
    %0 = arith.cmpi eq, %arg1, %c0_i32 : i32
    %1 = arith.extui %0 : i1 to i32
    %c0_i32_0 = arith.constant 0 : i32
    %2 = arith.cmpi ne, %1, %c0_i32_0 : i32
    scf.if %2 {
      %cst = arith.constant 0.000000e+00 : f32
      %15 = vector.broadcast %cst : f32 to vector<1x1xf32>
      %c0 = arith.constant 0 : index
      %c0_7 = arith.constant 0 : index
      %16 = vector.load %arg4[%c0, %c0_7] : memref<1x1xf32, #tpu.memory_space<vmem>>, vector<1x1xf32>
      tpu.vector_store %arg4[%c0, %c0_7], %15 {strides = array<i32>} : memref<1x1xf32, #tpu.memory_space<vmem>>, vector<1x1xf32>,
    } else {
    }
    %c1_i32 = arith.constant 1 : i32
    %3 = arith.muli %arg0, %c1_i32 : i32
    %4 = arith.addi %3, %arg1 : i32
    %c16_i32 = arith.constant 16 : i32
    %5 = arith.muli %4, %c16_i32 : i32
    %c0_i32_1 = arith.constant 0 : i32
    %6 = arith.cmpi slt, %4, %c0_i32_1 : i32
    %7 = arith.extui %6 : i1 to i32
    %c0_i32_2 = arith.constant 0 : i32
    %8 = arith.cmpi ne, %7, %c0_i32_2 : i32
    scf.if %8 {
      %cst = arith.constant 0.000000e+00 : f32
      %15 = vector.broadcast %cst : f32 to vector<1x1xf32>
      %c0_i32_7 = arith.constant 0 : i32
      %c16_i32_8 = arith.constant 16 : i32
      %16 = arith.muli %c0_i32_7, %c16_i32_8 : i32
      %17 = tpu.assume_multiple %16, 16 : i32
      %18 = arith.index_cast %17 : i32 to index
      %c0 = arith.constant 0 : index
      %19 = vector.load %arg2[%18, %c0] : memref<16x32xf32, #tpu.memory_space<vmem>>, vector<16x32xf32>
      %20 = arith.index_cast %17 : i32 to index
      %c0_9 = arith.constant 0 : index
      %21 = vector.load %arg3[%20, %c0_9] : memref<16x32xf32, #tpu.memory_space<vmem>>, vector<16x32xf32>
      %22 = arith.mulf %19, %21 : vector<16x32xf32>
      %cst_10 = arith.constant dense<0.000000e+00> : vector<16xf32>
      %23 = vector.multi_reduction <add>, %22, %cst_10 [1] : vector<16x32xf32> to vector<16xf32>
      %24 = vector.shape_cast %23 : vector<16xf32> to vector<16x1xf32>
      %25 = arith.mulf %19, %19 : vector<16x32xf32>
      %cst_11 = arith.constant dense<0.000000e+00> : vector<16xf32>
      %26 = vector.multi_reduction <add>, %25, %cst_11 [1] : vector<16x32xf32> to vector<16xf32>
      %27 = vector.shape_cast %26 : vector<16xf32> to vector<16x1xf32>
      %28 = arith.mulf %21, %21 : vector<16x32xf32>
      %cst_12 = arith.constant dense<0.000000e+00> : vector<16xf32>
      %29 = vector.multi_reduction <add>, %28, %cst_12 [1] : vector<16x32xf32> to vector<16xf32>
      %30 = vector.shape_cast %29 : vector<16xf32> to vector<16x1xf32>
      %31 = math.rsqrt %27 : vector<16x1xf32>
      %cst_13 = arith.constant 1.000000e+08 : f32
      %32 = vector.broadcast %cst_13 : f32 to vector<16x1xf32>
      %33 = arith.minimumf %31, %32 : vector<16x1xf32>
      %34 = math.rsqrt %30 : vector<16x1xf32>
      %cst_14 = arith.constant 1.000000e+08 : f32
      %35 = vector.broadcast %cst_14 : f32 to vector<16x1xf32>
      %36 = arith.minimumf %34, %35 : vector<16x1xf32>
      %37 = arith.mulf %24, %33 : vector<16x1xf32>
      %38 = arith.mulf %37, %36 : vector<16x1xf32>
      %cst_15 = arith.constant 1.000000e+00 : f32
      %39 = vector.broadcast %cst_15 : f32 to vector<16x1xf32>
      %40 = arith.subf %39, %38 : vector<16x1xf32>
      %41 = vector.shape_cast %40 : vector<16x1xf32> to vector<1x16x1xf32>
      %cst_16 = arith.constant dense<0.000000e+00> : vector<1xf32>
      %42 = vector.multi_reduction <add>, %41, %cst_16 [1, 2] : vector<1x16x1xf32> to vector<1xf32>
      %43 = vector.shape_cast %42 : vector<1xf32> to vector<1x1x1xf32>
      %44 = vector.extract %43[0, 0, 0] : f32 from vector<1x1x1xf32>
      %45 = vector.broadcast %44 : f32 to vector<1x1xf32>
      %46 = arith.addf %15, %45 : vector<1x1xf32>
      %c1_i32_17 = arith.constant 1 : i32
      %c0_18 = arith.constant 0 : index
      %c0_19 = arith.constant 0 : index
      %47 = vector.load %arg4[%c0_18, %c0_19] : memref<1x1xf32, #tpu.memory_space<vmem>>, vector<1x1xf32>
      %48 = arith.addf %47, %46 : vector<1x1xf32>
      %c0_20 = arith.constant 0 : index
      %c0_21 = arith.constant 0 : index
      %49 = vector.load %arg4[%c0_20, %c0_21] : memref<1x1xf32, #tpu.memory_space<vmem>>, vector<1x1xf32>
      tpu.vector_store %arg4[%c0_20, %c0_21], %48 {strides = array<i32>} : memref<1x1xf32, #tpu.memory_space<vmem>>, vector<1x1xf32>,
    } else {
    }
    %c0_i32_3 = arith.constant 0 : i32
    %9 = arith.cmpi sge, %4, %c0_i32_3 : i32
    %10 = arith.extui %9 : i1 to i32
    %c0_i32_4 = arith.constant 0 : i32
    %11 = arith.cmpi ne, %10, %c0_i32_4 : i32
    scf.if %11 {
      %cst = arith.constant 0.000000e+00 : f32
      %15 = vector.broadcast %cst : f32 to vector<1x1xf32>
      %c0_i32_7 = arith.constant 0 : i32
      %c16_i32_8 = arith.constant 16 : i32
      %16 = arith.muli %c0_i32_7, %c16_i32_8 : i32
      %17 = tpu.assume_multiple %16, 16 : i32
      %18 = arith.index_cast %17 : i32 to index
      %c0 = arith.constant 0 : index
      %19 = vector.load %arg2[%18, %c0] : memref<16x32xf32, #tpu.memory_space<vmem>>, vector<16x32xf32>
      %20 = arith.index_cast %17 : i32 to index
      %c0_9 = arith.constant 0 : index
      %21 = vector.load %arg3[%20, %c0_9] : memref<16x32xf32, #tpu.memory_space<vmem>>, vector<16x32xf32>
      %22 = arith.mulf %19, %21 : vector<16x32xf32>
      %cst_10 = arith.constant dense<0.000000e+00> : vector<16xf32>
      %23 = vector.multi_reduction <add>, %22, %cst_10 [1] : vector<16x32xf32> to vector<16xf32>
      %24 = vector.shape_cast %23 : vector<16xf32> to vector<16x1xf32>
      %25 = arith.mulf %19, %19 : vector<16x32xf32>
      %cst_11 = arith.constant dense<0.000000e+00> : vector<16xf32>
      %26 = vector.multi_reduction <add>, %25, %cst_11 [1] : vector<16x32xf32> to vector<16xf32>
      %27 = vector.shape_cast %26 : vector<16xf32> to vector<16x1xf32>
      %28 = arith.mulf %21, %21 : vector<16x32xf32>
      %cst_12 = arith.constant dense<0.000000e+00> : vector<16xf32>
      %29 = vector.multi_reduction <add>, %28, %cst_12 [1] : vector<16x32xf32> to vector<16xf32>
      %30 = vector.shape_cast %29 : vector<16xf32> to vector<16x1xf32>
      %31 = math.rsqrt %27 : vector<16x1xf32>
      %cst_13 = arith.constant 1.000000e+08 : f32
      %32 = vector.broadcast %cst_13 : f32 to vector<16x1xf32>
      %33 = arith.minimumf %31, %32 : vector<16x1xf32>
      %34 = math.rsqrt %30 : vector<16x1xf32>
      %cst_14 = arith.constant 1.000000e+08 : f32
      %35 = vector.broadcast %cst_14 : f32 to vector<16x1xf32>
      %36 = arith.minimumf %34, %35 : vector<16x1xf32>
      %37 = arith.mulf %24, %33 : vector<16x1xf32>
      %38 = arith.mulf %37, %36 : vector<16x1xf32>
      %cst_15 = arith.constant 1.000000e+00 : f32
      %39 = vector.broadcast %cst_15 : f32 to vector<16x1xf32>
      %40 = arith.subf %39, %38 : vector<16x1xf32>
      %41 = arith.addi %5, %17 : i32
      %42 = tpu.iota {dimensions = array<i32: 0>} : vector<16x1xi32>
      %43 = vector.broadcast %41 : i32 to vector<16x1xi32>
      %44 = arith.addi %43, %42 : vector<16x1xi32>
      %c16_i32_16 = arith.constant 16 : i32
      %45 = vector.broadcast %c16_i32_16 : i32 to vector<16x1xi32>
      %46 = arith.cmpi slt, %44, %45 : vector<16x1xi32>
      %cst_17 = arith.constant 0.000000e+00 : f32
      %47 = vector.broadcast %cst_17 : f32 to vector<16x1xf32>
      %48 = arith.select %46, %40, %47 : vector<16x1xi1>, vector<16x1xf32>
      %49 = vector.shape_cast %48 : vector<16x1xf32> to vector<1x16x1xf32>
      %cst_18 = arith.constant dense<0.000000e+00> : vector<1xf32>
      %50 = vector.multi_reduction <add>, %49, %cst_18 [1, 2] : vector<1x16x1xf32> to vector<1xf32>
      %51 = vector.shape_cast %50 : vector<1xf32> to vector<1x1x1xf32>
      %52 = vector.extract %51[0, 0, 0] : f32 from vector<1x1x1xf32>
      %53 = vector.broadcast %52 : f32 to vector<1x1xf32>
      %54 = arith.addf %15, %53 : vector<1x1xf32>
      %c1_i32_19 = arith.constant 1 : i32
      %c0_20 = arith.constant 0 : index
      %c0_21 = arith.constant 0 : index
      %55 = vector.load %arg4[%c0_20, %c0_21] : memref<1x1xf32, #tpu.memory_space<vmem>>, vector<1x1xf32>
      %56 = arith.addf %55, %54 : vector<1x1xf32>
      %c0_22 = arith.constant 0 : index
      %c0_23 = arith.constant 0 : index
      %57 = vector.load %arg4[%c0_22, %c0_23] : memref<1x1xf32, #tpu.memory_space<vmem>>, vector<1x1xf32>
      tpu.vector_store %arg4[%c0_22, %c0_23], %56 {strides = array<i32>} : memref<1x1xf32, #tpu.memory_space<vmem>>, vector<1x1xf32>,
    } else {
    }
    %c0_i32_5 = arith.constant 0 : i32
    %12 = arith.cmpi eq, %arg1, %c0_i32_5 : i32
    %13 = arith.extui %12 : i1 to i32
    %c0_i32_6 = arith.constant 0 : i32
    %14 = arith.cmpi ne, %13, %c0_i32_6 : i32
    scf.if %14 {
      %c0 = arith.constant 0 : index
      %c0_7 = arith.constant 0 : index
      %15 = vector.load %arg4[%c0, %c0_7] : memref<1x1xf32, #tpu.memory_space<vmem>>, vector<1x1xf32>
      %cst = arith.constant 6.250000e-02 : f32
      %16 = vector.broadcast %cst : f32 to vector<1x1xf32>
      %17 = arith.mulf %15, %16 : vector<1x1xf32>
      %c0_8 = arith.constant 0 : index
      %c0_9 = arith.constant 0 : index
      %18 = vector.load %arg4[%c0_8, %c0_9] : memref<1x1xf32, #tpu.memory_space<vmem>>, vector<1x1xf32>
      tpu.vector_store %arg4[%c0_8, %c0_9], %17 {strides = array<i32>} : memref<1x1xf32, #tpu.memory_space<vmem>>, vector<1x1xf32>,
    } else {
    }
    return
  }
  func.func @transform_0(%arg0: i32, %arg1: i32) -> (i32, i32) {
    %c1_i32 = arith.constant 1 : i32
    %0 = arith.muli %arg0, %c1_i32 : i32
    %1 = arith.addi %0, %arg1 : i32
    %c0_i32 = arith.constant 0 : i32
    %2 = arith.minsi %1, %c0_i32 : i32
    %c0_i32_0 = arith.constant 0 : i32
    %c0_i32_1 = arith.constant 0 : i32
    return %2, %c0_i32_0 : i32, i32
  }
  func.func @transform_1(%arg0: i32, %arg1: i32) -> (i32, i32) {
    %c1_i32 = arith.constant 1 : i32
    %0 = arith.muli %arg0, %c1_i32 : i32
    %1 = arith.addi %0, %arg1 : i32
    %c0_i32 = arith.constant 0 : i32
    %2 = arith.minsi %1, %c0_i32 : i32
    %c0_i32_0 = arith.constant 0 : i32
    %c0_i32_1 = arith.constant 0 : i32
    return %2, %c0_i32_0 : i32, i32
  }
  func.func @transform_2(%arg0: i32, %arg1: i32) -> (i32, i32) {
    %c0_i32 = arith.constant 0 : i32
    %c0_i32_0 = arith.constant 0 : i32
    return %arg0, %c0_i32 : i32, i32
  }
}

</mosaic_0001>

<bundles_post_ra>
// kernel: tpu_custom_call.1
= control target key start
LH: loop header
LB: loop body
LE: loop exit
PB: predicated region body
PF: predicated region fallthrough
CT: control target
= control target key end

     0   :  { %7 = vsyncpa [#allocation3], 0  ;;  %s449_s0 = inlined_call_operand.hbm [shape: f32[16,32], index: 0, kind: input, shape index: {}]   ;;  %s450_s1 = inlined_call_operand.hbm [shape: f32[16,32], index: 1, kind: input, shape index: {}]   ;;  %s451_s2 = inlined_call_operand.hbm [shape: f32[1,1], index: 2, kind: output, shape index: {}]  }
   0x1   :  { %8 = vsyncpa [#allocation6], 0 }
   0x2   :  { %9 = vsyncpa [#allocation4], 0  ;;  %s20_s11 = sshll.u32 %s449_s0, 4  ;;  %s410_s12 = smov [#allocation2]   ;;  %s21_s11 = int_to_ptr.hbm [resolvable:$true] %s20_s11 }
   0x3   :  { %s22_s13 = sshll.u32 %s410_s12, 4  ;;  %s39_s16 = sshll.u32 %s450_s1, 4  ;;  %s23_s13 = int_to_ptr.vmem [resolvable:$true] %s22_s13  ;;  %s40_s16 = int_to_ptr.hbm [resolvable:$true] %s39_s16 }
   0x4   :  { %s411_s17 = smov 128   ;;  %s412_s18 = smov 8  }
   0x5   :  { %28 = dma.hbm_to_vmem [thread:$0]  %s21_s11, 256, %s23_s13, [#allocation3], %s411_s17, %s411_s17, %s412_s18  }
   0x6   :  { %s413_s19 = smov [#allocation5]  }
   0x7   :  { %s41_s20 = sshll.u32 %s413_s19, 4  ;;  %s42_s20 = int_to_ptr.vmem [resolvable:$true] %s41_s20 }
   0x8   :  { %47 = dma.hbm_to_vmem [thread:$0]  %s40_s16, 256, %s42_s20, [#allocation6], %s411_s17, %s411_s17, %s412_s18  }
   0x9   :  { %404 = dma.done.wait [#allocation3], 256  }
   0xa   :  { %405 = vsyncadd [#allocation3], 4294967040 }
   0xb   :  { %406 = dma.done.wait [#allocation6], 256  }
   0xc   :  { %407 = vsyncadd [#allocation6], 4294967040  ;;  %v180_v0 = vld [vmem:[#allocation5] sm:$0xff]  ;;  %vm184_vm0 = vcmask 261120   ;;  %v178_v1 = vld [vmem:[#allocation2] sm:$0xff]  ;;  %vm268_vm13 = vcmask 7168  }
   0xd   :  { %v199_v2 = vmul.f32 %v180_v0, %v180_v0  ;;  %v191_v3 = vmul.f32 %v178_v1, %v178_v1  ;;  %v182_v4 = vmul.f32 %v180_v0, %v178_v1  ;;  %v181_v5 = vld [vmem:[#allocation5 + $0x8] sm:$0xff]  ;;  %v179_v6 = vld [vmem:[#allocation2 + $0x8] sm:$0xff]  ;;  %vm68_vm14 = vcmask 0   ;;  %s415_s1 = smov [#allocation7]   ;;  %s301_s24 = sshll.u32 %s451_s2, 4  ;;  %s302_s24 = int_to_ptr.hbm [resolvable:$true] %s301_s24 }
   0xe   :  { %v200_v10 = vmul.f32 %v181_v5, %v181_v5  ;;  %v192_v11 = vmul.f32 %v179_v6, %v179_v6  ;;  %v183_v12 = vmul.f32 %v181_v5, %v179_v6  ;;  %v414_v63 = vmov 0.0   ;;  %s299_s21 = sshll.u32 %s415_s1, 4  ;;  %s300_s21 = int_to_ptr.vmem [resolvable:$true] %s299_s21 }
   0xf   :  { %v201_v7 = vsel %vm184_vm0, %v199_v2, 0.0  ;;  %v193_v8 = vsel %vm184_vm0, %v191_v3, 0.0  ;;  %v185_v9 = vsel %vm184_vm0, %v182_v4, 0.0  ;;  %69 = vst.msk [vmem:[#allocation7] sm:$0x1] %vm68_vm14, %v414_v63 }
  0x10   :  { %202 = vadd.xlane.f32.xlu1 %v201_v7  ;;  %194 = vadd.xlane.f32.xlu0 %v193_v8  ;;  %v204_v13 = vsel %vm184_vm0, %v200_v10, 0.0  ;;  %v196_v14 = vsel %vm184_vm0, %v192_v11, 0.0  ;;  %v188_v15 = vsel %vm184_vm0, %v183_v12, 0.0 }
  0x11   :  { %186 = vadd.xlane.f32.xlu2 %v185_v9 }
  0x16   :  { %v283_v7 = vld [vmem:[#allocation7] sm:$0x1] }
  0x18   :  { %205 = vadd.xlane.f32.xlu1 %v204_v13  ;;  %197 = vadd.xlane.f32.xlu0 %v196_v14 }
  0x19   :  { %189 = vadd.xlane.f32.xlu2 %v188_v15 }
  0x83   :  { %v203_v16 = vpop.xlane.xlu1 %202  ;;  %v195_v17 = vpop.xlane.xlu0 %194 }
  0x84   :  { %324 = vrsqrt.f32 %v203_v16  ;;  %vm213_vm2 = vweird.f32 %v195_v17  ;;  %v187_v35 = vpop.xlane.xlu2 %186  ;;  %vm235_vm5 = vweird.f32 %v203_v16 }
  0x85   :  { %326 = vrsqrt.f32 %v195_v17 }
  0x8a   :  { %v325_v18 = vpop.eup %324 }
  0x8b   :  { %v327_v19 = vpop.eup %326  ;;  %v230_v20 = vmul.f32 %v325_v18, %v203_v16  ;;  %v206_v21 = vpop.xlane.xlu1 %205  ;;  %vm236_vm4 = vweird.f32 %v325_v18 }
  0x8c   :  { %v198_v22 = vpop.xlane.xlu0 %197  ;;  %v208_v23 = vmul.f32 %v327_v19, %v195_v17  ;;  %328 = vrsqrt.f32 %v206_v21  ;;  %vm214_vm1 = vweird.f32 %v327_v19  ;;  %vm237_vm6 = vmor %vm235_vm5, %vm236_vm4  ;;  %vm245_vm9 = vweird.f32 %v206_v21  ;;  %v190_v52 = vpop.xlane.xlu2 %189 }
  0x8d   :  { %v231_v24 = vmul.f32 %v325_v18, %v230_v20  ;;  %330 = vrsqrt.f32 %v198_v22  ;;  %vm215_vm3 = vmor %vm213_vm2, %vm214_vm1  ;;  %vm223_vm11 = vweird.f32 %v198_v22 }
  0x8e   :  { %v209_v25 = vmul.f32 %v327_v19, %v208_v23 }
  0x8f   :  { %v232_v26 = vmul.f32 0.5, %v231_v24 }
  0x90   :  { %v210_v27 = vmul.f32 0.5, %v209_v25 }
  0x91   :  { %v233_v29 = vsub.f32 1.5, %v232_v26 }
  0x92   :  { %v329_v28 = vpop.eup %328  ;;  %v211_v30 = vsub.f32 1.5, %v210_v27 }
  0x93   :  { %v331_v31 = vpop.eup %330  ;;  %v240_v32 = vmul.f32 %v329_v28, %v206_v21  ;;  %v234_v37 = vmul.f32 %v325_v18, %v233_v29  ;;  %vm246_vm7 = vweird.f32 %v329_v28 }
  0x94   :  { %v218_v33 = vmul.f32 %v331_v31, %v198_v22  ;;  %v212_v34 = vmul.f32 %v327_v19, %v211_v30  ;;  %vm224_vm8 = vweird.f32 %v331_v31  ;;  %vm247_vm10 = vmor %vm245_vm9, %vm246_vm7 }
  0x95   :  { %v241_v36 = vmul.f32 %v329_v28, %v240_v32  ;;  %v238_v45 = vsel %vm237_vm6, %v325_v18, %v234_v37  ;;  %vm225_vm12 = vmor %vm223_vm11, %vm224_vm8 }
  0x96   :  { %v219_v38 = vmul.f32 %v331_v31, %v218_v33  ;;  %v216_v39 = vsel %vm215_vm3, %v327_v19, %v212_v34  ;;  %v249_v49 = vmin.f32 %v238_v45, 1e+08 }
  0x97   :  { %v242_v40 = vmul.f32 0.5, %v241_v36  ;;  %v227_v41 = vmin.f32 %v216_v39, 1e+08 }
  0x98   :  { %v220_v42 = vmul.f32 0.5, %v219_v38 }
  0x99   :  { %v243_v43 = vsub.f32 1.5, %v242_v40  ;;  %v251_v47 = vmul.f32 %v227_v41, %v187_v35 }
  0x9a   :  { %v221_v44 = vsub.f32 1.5, %v220_v42 }
  0x9b   :  { %v244_v46 = vmul.f32 %v329_v28, %v243_v43  ;;  %v253_v53 = vmul.f32 %v251_v47, %v249_v49 }
  0x9c   :  { %v222_v48 = vmul.f32 %v331_v31, %v221_v44 }
  0x9d   :  { %v248_v51 = vsel %vm247_vm10, %v329_v28, %v244_v46  ;;  %v255_v57 = vsub.f32 1.0, %v253_v53 }
  0x9e   :  { %v226_v50 = vsel %vm225_vm12, %v331_v31, %v222_v48  ;;  %v250_v55 = vmin.f32 %v248_v51, 1e+08 }
  0x9f   :  { %v228_v54 = vmin.f32 %v226_v50, 1e+08  ;;  %v269_v60 = vsel %vm268_vm13, %v255_v57, 0.0 }
  0xa1   :  { %v252_v56 = vmul.f32 %v228_v54, %v190_v52 }
  0xa3   :  { %v254_v58 = vmul.f32 %v252_v56, %v250_v55 }
  0xa5   :  { %v256_v59 = vsub.f32 1.0, %v254_v58 }
  0xa7   :  { %v270_v61 = vsel %vm268_vm13, %v256_v59, 0.0 }
  0xa8   :  { %v271_v62 = vadd.f32 %v270_v61, %v269_v60 }
  0xaa   :  { %272 = vadd.xlane.f32.xlu0 %v271_v62 }
 0x11d   :  { %v273_v0 = vpop.xlane.xlu0 %272 }
 0x11e   :  { %v274_v1 = vrot.slane %v273_v0, 4 }
 0x120   :  { %v275_v2 = vadd.f32 %v274_v1, %v273_v0 }
 0x122   :  { %v276_v3 = vrot.slane %v275_v2, 2 }
 0x124   :  { %v277_v4 = vadd.f32 %v276_v3, %v275_v2 }
 0x126   :  { %v278_v5 = vrot.slane %v277_v4, 1 }
 0x128   :  { %v279_v6 = vadd.f32 %v278_v5, %v277_v4 }
 0x12a   :  { %316 = vpush %v279_v6 }
 0x15b   :  { %s317_s0 = spop %316 }
 0x15c   :  { %v281_v8 = vstv %s317_s0 }
 0x15d   :  { %v284_v9 = vadd.f32 %v283_v7, %v281_v8 }
 0x15f   :  { %286 = vst.msk [vmem:[#allocation7] sm:$0x1] %vm68_vm14, %v284_v9 }
 0x166   :  { %v290_v10 = vld [vmem:[#allocation7] sm:$0x1] }
 0x167   :  { %v291_v11 = vmul.f32 0.0625, %v290_v10 }
 0x169   :  { %293 = vst.msk [vmem:[#allocation7] sm:$0x1] %vm68_vm14, %v291_v11 }
 0x16a   :  { %304 = dma.vmem_to_hbm [thread:$0]  %s300_s21, 16, %s302_s24, [#allocation4]  }
 0x16b   :  { %408 = dma.done.wait [#allocation4], 16  }
 0x16c   :  { %409 = vsyncadd [#allocation4], 4294967280 }
 0x16d   :  { %309 = vsyncpa [#allocation3], 1 }
 0x16e   :  { %310 = vsyncpa [#allocation6], 1 }
 0x16f   :  { %311 = vsyncpa [#allocation4], 1 }

</bundles_post_ra>
